<compile_context>
chip_gen: v5e
topology: v5e:2x2
jax: 0.10.0
libtpu: 0.0.40
codegen_flags: <defaults>
</compile_context>

<pallas_src>
import jax
import jax.numpy as jnp
from jax.experimental import pallas as pl
from jax.experimental.pallas import tpu as pltpu

FACTOR = 0.5
_LANE = 128
_SMALL_SINGLE_BLOCK_BYTES = 512 * 1024        # below this, one unblocked call beats a pipelined grid
_RAGGED_SINGLE_BLOCK_BYTES = 8 * 1024 * 1024  # ragged sizes up to this run as one full-array block
_VMEM_LIMIT_BYTES = 32 * 1024 * 1024          # safe scoped VMEM on v5e / v6e / v7x


def _add_relu_kernel(x_ref, o_ref):
    # 2 VPU ops per vreg (vadd + vmax); kernel is bandwidth-bound, keep body minimal.
    o_ref[...] = jnp.maximum(x_ref[...] + FACTOR, 0)


def _is_v7x() -> bool:
    try:
        return "v7" in jax.devices()[0].device_kind.lower()
    except Exception:
        return False


def _choose_slab(total: int, sublane: int):
    """Lane-dense (rows, width): width a large multiple of 128, rows % sublane == 0."""
    for width in (8192, 4096, 2048, 1024, 512, 256, _LANE):
        if total % width == 0 and (total // width) % sublane == 0:
            return total // width, width
    return None


def _choose_block_rows(rows: int, sublane: int, row_bytes: int, block_bytes: int,
                       want_even_tiles: bool) -> int:
    """Largest sublane-multiple divisor of `rows` that fits the byte budget and yields
    >= 2 tiles (an even count when requested), when such a divisor exists."""
    target = max(sublane, (block_bytes // row_bytes) // sublane * sublane)
    block_rows = min(rows, target)
    while rows % block_rows != 0:
        block_rows -= sublane

    def ok(br):
        nt = rows // br
        return nt >= 2 and (not want_even_tiles or nt % 2 == 0)

    if not ok(block_rows):
        br = block_rows - sublane
        while br >= sublane:
            if rows % br == 0 and ok(br):
                return br
            br -= sublane
        if want_even_tiles:  # no even-tile divisor exists; relax the preference
            return _choose_block_rows(rows, sublane, row_bytes, block_bytes, False)
    return block_rows


@jax.jit
def my_test_model_forward(x: jax.Array) -> jax.Array:
    """Pallas implementation of MyTestModel.forward: relu(x + 0.5)."""
    if not jnp.issubdtype(x.dtype, jnp.floating):
        raise TypeError(f"my_test_model_forward expects a floating dtype, got {x.dtype}")

    orig_shape = x.shape
    total = x.size
    itemsize = x.dtype.itemsize
    total_bytes = total * itemsize
    # Sublane pack: 8 rows for 32-bit, 16 for bf16, 32 for 8-bit dtypes.
    sublane = 8 * max(1, 4 // itemsize)

    slab = _choose_slab(total, sublane)
    pad = 0
    if slab is not None:
        rows, width = slab
    elif total_bytes <= _RAGGED_SINGLE_BLOCK_BYTES:
        # Ragged but small: run one full-array block ((8,128) rule doesn't apply), no pad copy.
        rows, width = 1, total
    else:
        # TODO(synk): large ragged sizes still use a pad copy; a masked tail block
        # (pl.when + pltpu.store with a lane mask) would avoid the extra HBM pass.
        width = _LANE
        rows = (-(-(-(-total // width)) // sublane)) * sublane
        pad = rows * width - total

    x_flat = x.reshape(-1)
    if pad:
        x_flat = jnp.pad(x_flat, (0, pad))
    x2d = x_flat.reshape(rows, width)

    is_v7x = _is_v7x()
    block_bytes = (4 if is_v7x else 2) * 1024 * 1024  # bigger tiles pay off on v7x's faster HBM

    if rows == 1 or total_bytes <= _SMALL_SINGLE_BLOCK_BYTES:
        # Single unblocked block: skip grid / pipeline machinery entirely for tiny inputs.
        out2d = pl.pallas_call(
            _add_relu_kernel,
            out_shape=jax.ShapeDtypeStruct((rows, width), x.dtype),
            in_specs=[pl.BlockSpec(memory_space=pltpu.MemorySpace.VMEM)],
            out_specs=pl.BlockSpec(memory_space=pltpu.MemorySpace.VMEM),
        )(x2d)
    else:
        block_rows = _choose_block_rows(rows, sublane, width * itemsize, block_bytes,
                                        want_even_tiles=is_v7x)
        out2d = pl.pallas_call(
            _add_relu_kernel,
            out_shape=jax.ShapeDtypeStruct((rows, width), x.dtype),
            grid=(rows // block_rows,),
            in_specs=[pl.BlockSpec((block_rows, width), lambda i: (i, 0))],
            out_specs=pl.BlockSpec((block_rows, width), lambda i: (i, 0)),
            compiler_params=pltpu.CompilerParams(
                # "parallel": shards row-tiles across both TensorCores on v7x; neutral on v5e/v6e.
                dimension_semantics=("parallel",),
                vmem_limit_bytes=_VMEM_LIMIT_BYTES,  # 2 in + 2 out buffers fit with headroom
            ),
        )(x2d)

    out_flat = out2d.reshape(-1)
    if pad:
        out_flat = out_flat[:total]
    return out_flat.reshape(orig_shape)


if __name__ == "__main__":
    key = jax.random.PRNGKey(0)
    # Small NCHW input consistent with the module's forward (pure elementwise).
    x = jax.random.normal(key, (2, 4, 16, 16), dtype=jnp.float32)

    out = jax.block_until_ready(my_test_model_forward(x))

    # Reference check in plain JAX.
    ref = jnp.maximum(x + FACTOR, 0.0)
    assert out.shape == x.shape
    assert out.dtype == x.dtype
    assert jnp.allclose(out, ref, atol=1e-6), "mismatch vs reference"

    print("KERNEL_OK")
</pallas_src>

<mosaic_0001>
module attributes {stable_mosaic.version = 11 : i64} {
  func.func @_add_relu_kernel(%arg0: memref<8x256xf32, #tpu.memory_space<vmem>>, %arg1: memref<8x256xf32, #tpu.memory_space<vmem>>) attributes {dimension_semantics = [], scalar_prefetch = 0 : i64, scratch_operands = 0 : i64, tpu.core_type = #tpu.core_type<tc>} {
    %c0 = arith.constant 0 : index
    %c0_0 = arith.constant 0 : index
    %0 = vector.load %arg0[%c0, %c0_0] : memref<8x256xf32, #tpu.memory_space<vmem>>, vector<8x256xf32>
    %cst = arith.constant 5.000000e-01 : f32
    %1 = vector.broadcast %cst : f32 to vector<8x256xf32>
    %2 = arith.addf %0, %1 : vector<8x256xf32>
    %cst_1 = arith.constant 0.000000e+00 : f32
    %3 = vector.broadcast %cst_1 : f32 to vector<8x256xf32>
    %4 = arith.maximumf %2, %3 : vector<8x256xf32>
    %c0_2 = arith.constant 0 : index
    %c0_3 = arith.constant 0 : index
    %5 = vector.load %arg1[%c0_2, %c0_3] : memref<8x256xf32, #tpu.memory_space<vmem>>, vector<8x256xf32>
    tpu.vector_store %arg1[%c0_2, %c0_3], %4 {strides = array<i32>} : memref<8x256xf32, #tpu.memory_space<vmem>>, vector<8x256xf32>,
    return
  }
}

</mosaic_0001>

<bundles_post_ra>
// kernel: my_test_model_forward.1
= control target key start
LH: loop header
LB: loop body
LE: loop exit
PB: predicated region body
PF: predicated region fallthrough
CT: control target
= control target key end

     0   :  { %s42_s0 = inlined_call_operand.vmem [shape: f32[8,256], index: 0, kind: input, shape index: {}]   ;;  %s43_s1 = inlined_call_operand.vmem [shape: f32[8,256], index: 1, kind: output, shape index: {}]  }
   0x1   :  { %v8_v0 = vld [vmem:[%s42_s0] sm:$0xff]  ;;  %v9_v1 = vld [vmem:[%s42_s0 + $0x8] sm:$0xff] }
   0x2   :  { %v10_v2 = vadd.f32 0.5, %v8_v0  ;;  %v11_v3 = vadd.f32 0.5, %v9_v1 }
   0x4   :  { %v12_v4 = vmax.f32 %v10_v2, 0.0  ;;  %v13_v5 = vmax.f32 %v11_v3, 0.0 }
   0x6   :  { %14 = vst [vmem:[%s43_s1] sm:$0xff] %v12_v4 }
   0x7   :  { %15 = vst [vmem:[%s43_s1 + $0x8] sm:$0xff] %v13_v5 }

</bundles_post_ra>
